<compile_context>
chip_gen: v6e
topology: v6e:2x2x1
jax: 0.10.0
libtpu: 0.0.40
codegen_flags: <defaults>
</compile_context>

<pallas_src>
import functools

import jax
import jax.numpy as jnp
from jax.experimental import pallas as pl
from jax.experimental.pallas import tpu as pltpu


def _round_up(n, m):
    return ((n + m - 1) // m) * m


def molwise_kernel(rbf_ref, x_ref, eidx_ref, abatch_ref,
                   w_rbf_ref, b_rbf_ref,
                   w1_ref, b1_ref, w2_ref, b2_ref, w3_ref, b3_ref,
                   out_ref, acc_ref, *, pool_mean, final_reduce):
    step = pl.program_id(0)
    num_steps = pl.num_programs(0)

    @pl.when(step == 0)
    def _init():
        acc_ref[...] = jnp.zeros_like(acc_ref)

    # ---- streamed per-edge-tile work -------------------------------------
    # lin_rbf: bf16 operands on the MXU, f32 accumulation, f32 bias.
    rbf_filter = jnp.dot(rbf_ref[...], w_rbf_ref[...],
                         preferred_element_type=jnp.float32) + b_rbf_ref[...]
    edge_out = rbf_filter * x_ref[...].astype(jnp.float32)       # [TE, C] f32

    # scatter_add(edge -> atom) as a per-tile one-hot matmul on the MXU.
    eidx = eidx_ref[...]                                          # [1, TE] i32
    a_pad = acc_ref.shape[0]
    te = eidx.shape[1]
    atom_iota = jax.lax.broadcasted_iota(jnp.int32, (a_pad, te), 0)
    onehot_e = (eidx == atom_iota).astype(jnp.bfloat16)           # [A, TE]
    acc_ref[...] += jnp.dot(onehot_e, edge_out.astype(jnp.bfloat16),
                            preferred_element_type=jnp.float32)   # [A, C] f32

    # ---- epilogue: atom -> molecule pool, then MLP (runs once) -----------
    @pl.when(step == num_steps - 1)
    def _epilogue():
        abatch = abatch_ref[...]                                  # [1, A] i32
        b_pad = out_ref.shape[0]
        mol_iota = jax.lax.broadcasted_iota(jnp.int32, (b_pad, a_pad), 0)
        onehot_m = abatch == mol_iota                             # [B, A] bool
        pooled = jnp.dot(onehot_m.astype(jnp.bfloat16),
                         acc_ref[...].astype(jnp.bfloat16),
                         preferred_element_type=jnp.float32)      # [B, C] f32
        if pool_mean:
            count = jnp.sum(onehot_m.astype(jnp.float32), axis=-1,
                            keepdims=True)                        # [B, 1]
            pooled = pooled * pl.reciprocal(jnp.maximum(count, 1.0),
                                            approx=True)

        h = jnp.dot(pooled.astype(jnp.bfloat16), w1_ref[...],
                    preferred_element_type=jnp.float32) + b1_ref[...]
        h = h * jax.nn.sigmoid(h)                                 # SiLU (EUP)
        h = jnp.dot(h.astype(jnp.bfloat16), w2_ref[...],
                    preferred_element_type=jnp.float32) + b2_ref[...]
        h = h * jax.nn.sigmoid(h)

        if final_reduce:
            # num_target == 1: VPU multiply + cross-lane (XLU) reduce — skips a
            # 1-column MXU pass.  w3 is stored lane-dense as [1, C] f32.
            out = jnp.sum(h * w3_ref[...], axis=-1, keepdims=True) + b3_ref[...]
        else:
            out = jnp.dot(h.astype(jnp.bfloat16), w3_ref[...],
                          preferred_element_type=jnp.float32) + b3_ref[...]
        out_ref[...] = out.astype(out_ref.dtype)


def molwise_forward(rbf, x, edge_index_0, atom_batch, params,
                    num_atoms, dim_size, pool_option="mean", edge_tile=256):
    assert pool_option in ("mean", "add")
    assert edge_tile % 128 == 0
    E, R = rbf.shape
    C = x.shape[1]
    T = params["w3"].shape[1]

    TE = edge_tile
    E_pad = _round_up(max(E, 1), TE)
    A_pad = _round_up(max(num_atoms, 1), 8)
    B_pad = _round_up(max(dim_size, 1), 8)
    C_pad = _round_up(C, 128)              # lane-dense feature dim

    # --- pad / cast inputs (bf16 halves HBM traffic on the edge streams) ---
    rbf_p = jnp.zeros((E_pad, R), jnp.bfloat16).at[:E].set(
        rbf.astype(jnp.bfloat16))
    x_p = jnp.zeros((E_pad, C_pad), jnp.bfloat16).at[:E, :C].set(
        x.astype(jnp.bfloat16))
    eidx_p = jnp.full((1, E_pad), -1, jnp.int32).at[0, :E].set(
        edge_index_0.astype(jnp.int32))
    ab_p = jnp.full((1, A_pad), -1, jnp.int32).at[0, :num_atoms].set(
        atom_batch.astype(jnp.int32))

    def pad2(w, rows, cols, dtype):
        out = jnp.zeros((rows, cols), dtype)
        return out.at[:w.shape[0], :w.shape[1]].set(w.astype(dtype))

    w_rbf = pad2(params["w_rbf"], R, C_pad, jnp.bfloat16)
    b_rbf = pad2(params["b_rbf"], 1, C_pad, jnp.float32)
    w1 = pad2(params["w1"], C_pad, C_pad, jnp.bfloat16)
    b1 = pad2(params["b1"], 1, C_pad, jnp.float32)
    w2 = pad2(params["w2"], C_pad, C_pad, jnp.bfloat16)
    b2 = pad2(params["b2"], 1, C_pad, jnp.float32)

    final_reduce = (T == 1)
    if final_reduce:
        w3 = pad2(params["w3"].T, 1, C_pad, jnp.float32)   # [1, C] lane-dense
        b3 = params["b3"].astype(jnp.float32).reshape(1, 1)
        T_out = 1
    else:
        T_out = _round_up(T, 128)
        w3 = pad2(params["w3"], C_pad, T_out, jnp.bfloat16)
        b3 = pad2(params["b3"], 1, T_out, jnp.float32)

    kernel = functools.partial(molwise_kernel,
                               pool_mean=(pool_option == "mean"),
                               final_reduce=final_reduce)

    grid = (E_pad // TE,)
    resident = lambda e: (0, 0)            # same block every step -> stays in VMEM
    in_specs = [
        pl.BlockSpec((TE, R), lambda e: (e, 0)),       # rbf tile
        pl.BlockSpec((TE, C_pad), lambda e: (e, 0)),   # x tile
        pl.BlockSpec((1, TE), lambda e: (0, e)),       # edge_index tile
        pl.BlockSpec((1, A_pad), resident),            # atom_batch
        pl.BlockSpec((R, C_pad), resident),            # w_rbf
        pl.BlockSpec((1, C_pad), resident),            # b_rbf
        pl.BlockSpec((C_pad, C_pad), resident),        # w1
        pl.BlockSpec((1, C_pad), resident),            # b1
        pl.BlockSpec((C_pad, C_pad), resident),        # w2
        pl.BlockSpec((1, C_pad), resident),            # b2
        pl.BlockSpec(w3.shape, resident),              # w3
        pl.BlockSpec(b3.shape, resident),              # b3
    ]

    out = pl.pallas_call(
        kernel,
        out_shape=jax.ShapeDtypeStruct((B_pad, T_out), jnp.float32),
        grid_spec=pltpu.PrefetchScalarGridSpec(
            num_scalar_prefetch=0,
            grid=grid,
            in_specs=in_specs,
            out_specs=pl.BlockSpec((B_pad, T_out), resident),
            scratch_shapes=[pltpu.VMEM((A_pad, C_pad), jnp.float32)],
        ),
        compiler_params=pltpu.CompilerParams(
            dimension_semantics=("arbitrary",),        # reduction axis
            vmem_limit_bytes=64 * 1024 * 1024,
        ),
    )(rbf_p, x_p, eidx_p, ab_p, w_rbf, b_rbf, w1, b1, w2, b2, w3, b3)
    return out[:dim_size, :T]


def glorot_ortho(key, fan_in, fan_out):
    """Deterministic Glorot-scaled orthogonal init (stand-in for Glorot_Ortho_)."""
    a = jax.random.normal(key, (max(fan_out, fan_in), min(fan_out, fan_in)),
                          jnp.float32)
    q, _ = jnp.linalg.qr(a)
    w = q if fan_out >= fan_in else q.T          # [fan_out, fan_in]
    scale = jnp.sqrt(2.0 / (fan_in + fan_out))
    return (w * scale).T                          # stored as [fan_in, fan_out]


def init_params(key, in_channels, rbf_dim, num_target):
    ks = jax.random.split(key, 4)
    return {
        "w_rbf": glorot_ortho(ks[0], rbf_dim, in_channels),     # [R, C]
        "b_rbf": jnp.zeros((1, in_channels), jnp.float32),
        "w1": glorot_ortho(ks[1], in_channels, in_channels),    # [C, C]
        "b1": jnp.full((1, in_channels), 0.01, jnp.float32),
        "w2": glorot_ortho(ks[2], in_channels, in_channels),    # [C, C]
        "b2": jnp.full((1, in_channels), -0.01, jnp.float32),
        "w3": glorot_ortho(ks[3], in_channels, num_target),     # [C, T]
        "b3": jnp.zeros((1, num_target), jnp.float32),
    }


def molwise_reference(rbf, x, edge_index_0, atom_batch, params,
                      num_atoms, dim_size, pool_option="mean"):
    """Pure-JAX f32 reference for correctness check."""
    rbf_filter = rbf @ params["w_rbf"] + params["b_rbf"]
    out = rbf_filter * x
    out = jax.ops.segment_sum(out, edge_index_0, num_segments=num_atoms)
    pooled = jax.ops.segment_sum(out, atom_batch, num_segments=dim_size)
    if pool_option == "mean":
        count = jax.ops.segment_sum(jnp.ones((num_atoms, 1), jnp.float32),
                                    atom_batch, num_segments=dim_size)
        pooled = pooled / jnp.maximum(count, 1.0)
    h = pooled @ params["w1"] + params["b1"]
    h = h * jax.nn.sigmoid(h)
    h = h @ params["w2"] + params["b2"]
    h = h * jax.nn.sigmoid(h)
    return h @ params["w3"] + params["b3"]


if __name__ == "__main__":
    # Small but non-trivial shapes: 600 edges (-> 3 edge tiles of 256 after
    # padding), 37 atoms, 4 molecules, 128 channels (lane-dense), 6 rbf, 1 target.
    E, A, B = 600, 37, 4
    C, R, T = 128, 6, 1

    key = jax.random.PRNGKey(0)
    k_rbf, k_x, k_ei, k_ab, k_p = jax.random.split(key, 5)

    rbf = jax.random.normal(k_rbf, (E, R), jnp.float32)
    x = jax.random.normal(k_x, (E, C), jnp.float32)
    edge_index_0 = jax.random.randint(k_ei, (E,), 0, A, jnp.int32)
    atom_batch = jnp.sort(jax.random.randint(k_ab, (A,), 0, B, jnp.int32))

    params = init_params(k_p, C, R, T)

    for pool in ("mean", "add"):
        out = molwise_forward(rbf, x, edge_index_0, atom_batch, params,
                              num_atoms=A, dim_size=B, pool_option=pool,
                              edge_tile=256)
        out = jax.block_until_ready(out)
        ref = molwise_reference(rbf, x, edge_index_0, atom_batch, params,
                                num_atoms=A, dim_size=B, pool_option=pool)
        assert out.shape == (B, T)
        # bf16 MXU operands -> compare with bf16-appropriate tolerance.
        assert jnp.allclose(out, ref, atol=3e-3, rtol=3e-2), (pool, out, ref)

    print("KERNEL_OK")
</pallas_src>

<mosaic_0001>
module attributes {stable_mosaic.version = 11 : i64} {
  func.func @molwise_kernel(%arg0: i32, %arg1: memref<256x6xbf16, #tpu.memory_space<vmem>>, %arg2: memref<256x128xbf16, #tpu.memory_space<vmem>>, %arg3: memref<1x256xi32, #tpu.memory_space<vmem>>, %arg4: memref<1x40xi32, #tpu.memory_space<vmem>>, %arg5: memref<6x128xbf16, #tpu.memory_space<vmem>>, %arg6: memref<1x128xf32, #tpu.memory_space<vmem>>, %arg7: memref<128x128xbf16, #tpu.memory_space<vmem>>, %arg8: memref<1x128xf32, #tpu.memory_space<vmem>>, %arg9: memref<128x128xbf16, #tpu.memory_space<vmem>>, %arg10: memref<1x128xf32, #tpu.memory_space<vmem>>, %arg11: memref<1x128xf32, #tpu.memory_space<vmem>>, %arg12: memref<1x1xf32, #tpu.memory_space<vmem>>, %arg13: memref<8x1xf32, #tpu.memory_space<vmem>>, %arg14: memref<40x128xf32, #tpu.memory_space<vmem>>) attributes {dimension_semantics = [#tpu.dimension_semantics<arbitrary>], iteration_bounds = array<i64: 3>, scalar_prefetch = 0 : i64, scratch_operands = 1 : i64, tpu.core_type = #tpu.core_type<tc>, window_params = [{transform_indices = @transform_0, window_bounds = array<i64: 256, 6>}, {transform_indices = @transform_1, window_bounds = array<i64: 256, 128>}, {transform_indices = @transform_2, window_bounds = array<i64: 1, 256>}, {pipeline_mode = #tpu.pipeline_mode<synchronous>, transform_indices = @transform_3, window_bounds = array<i64: 1, 40>}, {pipeline_mode = #tpu.pipeline_mode<synchronous>, transform_indices = @transform_4, window_bounds = array<i64: 6, 128>}, {pipeline_mode = #tpu.pipeline_mode<synchronous>, transform_indices = @transform_5, window_bounds = array<i64: 1, 128>}, {pipeline_mode = #tpu.pipeline_mode<synchronous>, transform_indices = @transform_6, window_bounds = array<i64: 128, 128>}, {pipeline_mode = #tpu.pipeline_mode<synchronous>, transform_indices = @transform_7, window_bounds = array<i64: 1, 128>}, {pipeline_mode = #tpu.pipeline_mode<synchronous>, transform_indices = @transform_8, window_bounds = array<i64: 128, 128>}, {pipeline_mode = #tpu.pipeline_mode<synchronous>, transform_indices = @transform_9, window_bounds = array<i64: 1, 128>}, {pipeline_mode = #tpu.pipeline_mode<synchronous>, transform_indices = @transform_10, window_bounds = array<i64: 1, 128>}, {pipeline_mode = #tpu.pipeline_mode<synchronous>, transform_indices = @transform_11, window_bounds = array<i64: 1, 1>}, {pipeline_mode = #tpu.pipeline_mode<synchronous>, transform_indices = @transform_12, window_bounds = array<i64: 8, 1>}]} {
    %c0_i32 = arith.constant 0 : i32
    %0 = arith.cmpi eq, %arg0, %c0_i32 : i32
    %1 = arith.extui %0 : i1 to i32
    %c0_i32_0 = arith.constant 0 : i32
    %2 = arith.cmpi ne, %1, %c0_i32_0 : i32
    scf.if %2 {
      %cst_16 = arith.constant 0.000000e+00 : f32
      %27 = vector.broadcast %cst_16 : f32 to vector<40x128xf32>
      %c0_17 = arith.constant 0 : index
      %c0_18 = arith.constant 0 : index
      %28 = vector.load %arg14[%c0_17, %c0_18] : memref<40x128xf32, #tpu.memory_space<vmem>>, vector<40x128xf32>
      tpu.vector_store %arg14[%c0_17, %c0_18], %27 {strides = array<i32>} : memref<40x128xf32, #tpu.memory_space<vmem>>, vector<40x128xf32>,
    } else {
    }
    %c0 = arith.constant 0 : index
    %c0_1 = arith.constant 0 : index
    %3 = vector.load %arg1[%c0, %c0_1] : memref<256x6xbf16, #tpu.memory_space<vmem>>, vector<256x6xbf16>
    %c0_2 = arith.constant 0 : index
    %c0_3 = arith.constant 0 : index
    %4 = vector.load %arg5[%c0_2, %c0_3] : memref<6x128xbf16, #tpu.memory_space<vmem>>, vector<6x128xbf16>
    %cst = arith.constant dense<0.000000e+00> : vector<256x128xf32>
    %5 = tpu.matmul %3, %4, %cst {dimension_numbers = #tpu.dot_dimension_numbers<[1], [0], [0], [1], [0, 0, 1, 1], [], []>} : vector<256x6xbf16>, vector<6x128xbf16>, vector<256x128xf32> -> vector<256x128xf32>
    %c0_4 = arith.constant 0 : index
    %c0_5 = arith.constant 0 : index
    %6 = vector.load %arg6[%c0_4, %c0_5] : memref<1x128xf32, #tpu.memory_space<vmem>>, vector<1x128xf32>
    %7 = vector.broadcast %6 : vector<1x128xf32> to vector<256x128xf32>
    %8 = arith.addf %5, %7 : vector<256x128xf32>
    %c0_6 = arith.constant 0 : index
    %c0_7 = arith.constant 0 : index
    %9 = vector.load %arg2[%c0_6, %c0_7] : memref<256x128xbf16, #tpu.memory_space<vmem>>, vector<256x128xbf16>
    %10 = arith.extf %9 : vector<256x128xbf16> to vector<256x128xf32>
    %11 = arith.mulf %8, %10 : vector<256x128xf32>
    %c0_8 = arith.constant 0 : index
    %c0_9 = arith.constant 0 : index
    %12 = vector.load %arg3[%c0_8, %c0_9] : memref<1x256xi32, #tpu.memory_space<vmem>>, vector<1x256xi32>
    %13 = tpu.iota {dimensions = array<i32: 0>} : vector<40x256xi32>
    %14 = vector.broadcast %12 : vector<1x256xi32> to vector<40x256xi32>
    %15 = arith.cmpi eq, %14, %13 : vector<40x256xi32>
    %16 = arith.extui %15 : vector<40x256xi1> to vector<40x256xi32>
    %17 = arith.sitofp %16 : vector<40x256xi32> to vector<40x256xf32>
    %18 = arith.truncf %17 : vector<40x256xf32> to vector<40x256xbf16>
    %c0_10 = arith.constant 0 : index
    %c0_11 = arith.constant 0 : index
    %19 = vector.load %arg14[%c0_10, %c0_11] : memref<40x128xf32, #tpu.memory_space<vmem>>, vector<40x128xf32>
    %20 = arith.truncf %11 : vector<256x128xf32> to vector<256x128xbf16>
    %cst_12 = arith.constant dense<0.000000e+00> : vector<40x128xf32>
    %21 = tpu.matmul %18, %20, %cst_12 {dimension_numbers = #tpu.dot_dimension_numbers<[1], [0], [0], [1], [0, 0, 1, 1], [], []>} : vector<40x256xbf16>, vector<256x128xbf16>, vector<40x128xf32> -> vector<40x128xf32>
    %22 = arith.addf %19, %21 : vector<40x128xf32>
    %c0_13 = arith.constant 0 : index
    %c0_14 = arith.constant 0 : index
    %23 = vector.load %arg14[%c0_13, %c0_14] : memref<40x128xf32, #tpu.memory_space<vmem>>, vector<40x128xf32>
    tpu.vector_store %arg14[%c0_13, %c0_14], %22 {strides = array<i32>} : memref<40x128xf32, #tpu.memory_space<vmem>>, vector<40x128xf32>,
    %c2_i32 = arith.constant 2 : i32
    %24 = arith.cmpi eq, %arg0, %c2_i32 : i32
    %25 = arith.extui %24 : i1 to i32
    %c0_i32_15 = arith.constant 0 : i32
    %26 = arith.cmpi ne, %25, %c0_i32_15 : i32
    scf.if %26 {
      %c0_16 = arith.constant 0 : index
      %c0_17 = arith.constant 0 : index
      %27 = vector.load %arg4[%c0_16, %c0_17] : memref<1x40xi32, #tpu.memory_space<vmem>>, vector<1x40xi32>
      %28 = tpu.iota {dimensions = array<i32: 0>} : vector<8x40xi32>
      %29 = vector.broadcast %27 : vector<1x40xi32> to vector<8x40xi32>
      %30 = arith.cmpi eq, %29, %28 : vector<8x40xi32>
      %31 = arith.extui %30 : vector<8x40xi1> to vector<8x40xi32>
      %32 = arith.sitofp %31 : vector<8x40xi32> to vector<8x40xf32>
      %33 = arith.truncf %32 : vector<8x40xf32> to vector<8x40xbf16>
      %c0_18 = arith.constant 0 : index
      %c0_19 = arith.constant 0 : index
      %34 = vector.load %arg14[%c0_18, %c0_19] : memref<40x128xf32, #tpu.memory_space<vmem>>, vector<40x128xf32>
      %35 = arith.truncf %34 : vector<40x128xf32> to vector<40x128xbf16>
      %cst_20 = arith.constant dense<0.000000e+00> : vector<8x128xf32>
      %36 = tpu.matmul %33, %35, %cst_20 {dimension_numbers = #tpu.dot_dimension_numbers<[1], [0], [0], [1], [0, 0, 1, 1], [], []>} : vector<8x40xbf16>, vector<40x128xbf16>, vector<8x128xf32> -> vector<8x128xf32>
      %37 = arith.extui %30 : vector<8x40xi1> to vector<8x40xi32>
      %38 = arith.sitofp %37 : vector<8x40xi32> to vector<8x40xf32>
      %cst_21 = arith.constant dense<0.000000e+00> : vector<8xf32>
      %39 = vector.multi_reduction <add>, %38, %cst_21 [1] : vector<8x40xf32> to vector<8xf32>
      %40 = vector.shape_cast %39 : vector<8xf32> to vector<8x1xf32>
      %cst_22 = arith.constant 1.000000e+00 : f32
      %41 = vector.broadcast %cst_22 : f32 to vector<8x1xf32>
      %42 = arith.maximumf %40, %41 : vector<8x1xf32>
      %43 = tpu.reciprocal %42 {approx = true} : vector<8x1xf32> -> vector<8x1xf32>
      %44 = vector.broadcast %43 : vector<8x1xf32> to vector<8x128xf32>
      %45 = arith.mulf %36, %44 : vector<8x128xf32>
      %46 = arith.truncf %45 : vector<8x128xf32> to vector<8x128xbf16>
      %c0_23 = arith.constant 0 : index
      %c0_24 = arith.constant 0 : index
      %47 = vector.load %arg7[%c0_23, %c0_24] : memref<128x128xbf16, #tpu.memory_space<vmem>>, vector<128x128xbf16>
      %cst_25 = arith.constant dense<0.000000e+00> : vector<8x128xf32>
      %48 = tpu.matmul %46, %47, %cst_25 {dimension_numbers = #tpu.dot_dimension_numbers<[1], [0], [0], [1], [0, 0, 1, 1], [], []>} : vector<8x128xbf16>, vector<128x128xbf16>, vector<8x128xf32> -> vector<8x128xf32>
      %c0_26 = arith.constant 0 : index
      %c0_27 = arith.constant 0 : index
      %49 = vector.load %arg8[%c0_26, %c0_27] : memref<1x128xf32, #tpu.memory_space<vmem>>, vector<1x128xf32>
      %50 = vector.broadcast %49 : vector<1x128xf32> to vector<8x128xf32>
      %51 = arith.addf %48, %50 : vector<8x128xf32>
      %52 = arith.negf %51 : vector<8x128xf32>
      %53 = math.exp %52 : vector<8x128xf32>
      %cst_28 = arith.constant 1.000000e+00 : f32
      %54 = vector.broadcast %cst_28 : f32 to vector<8x128xf32>
      %55 = arith.addf %54, %53 : vector<8x128xf32>
      %56 = arith.divf %54, %55 : vector<8x128xf32>
      %57 = arith.mulf %51, %56 : vector<8x128xf32>
      %58 = arith.truncf %57 : vector<8x128xf32> to vector<8x128xbf16>
      %c0_29 = arith.constant 0 : index
      %c0_30 = arith.constant 0 : index
      %59 = vector.load %arg9[%c0_29, %c0_30] : memref<128x128xbf16, #tpu.memory_space<vmem>>, vector<128x128xbf16>
      %cst_31 = arith.constant dense<0.000000e+00> : vector<8x128xf32>
      %60 = tpu.matmul %58, %59, %cst_31 {dimension_numbers = #tpu.dot_dimension_numbers<[1], [0], [0], [1], [0, 0, 1, 1], [], []>} : vector<8x128xbf16>, vector<128x128xbf16>, vector<8x128xf32> -> vector<8x128xf32>
      %c0_32 = arith.constant 0 : index
      %c0_33 = arith.constant 0 : index
      %61 = vector.load %arg10[%c0_32, %c0_33] : memref<1x128xf32, #tpu.memory_space<vmem>>, vector<1x128xf32>
      %62 = vector.broadcast %61 : vector<1x128xf32> to vector<8x128xf32>
      %63 = arith.addf %60, %62 : vector<8x128xf32>
      %64 = arith.negf %63 : vector<8x128xf32>
      %65 = math.exp %64 : vector<8x128xf32>
      %cst_34 = arith.constant 1.000000e+00 : f32
      %66 = vector.broadcast %cst_34 : f32 to vector<8x128xf32>
      %67 = arith.addf %66, %65 : vector<8x128xf32>
      %68 = arith.divf %66, %67 : vector<8x128xf32>
      %69 = arith.mulf %63, %68 : vector<8x128xf32>
      %c0_35 = arith.constant 0 : index
      %c0_36 = arith.constant 0 : index
      %70 = vector.load %arg11[%c0_35, %c0_36] : memref<1x128xf32, #tpu.memory_space<vmem>>, vector<1x128xf32>
      %71 = vector.broadcast %70 : vector<1x128xf32> to vector<8x128xf32>
      %72 = arith.mulf %69, %71 : vector<8x128xf32>
      %cst_37 = arith.constant dense<0.000000e+00> : vector<8xf32>
      %73 = vector.multi_reduction <add>, %72, %cst_37 [1] : vector<8x128xf32> to vector<8xf32>
      %74 = vector.shape_cast %73 : vector<8xf32> to vector<8x1xf32>
      %c0_38 = arith.constant 0 : index
      %c0_39 = arith.constant 0 : index
      %75 = vector.load %arg12[%c0_38, %c0_39] : memref<1x1xf32, #tpu.memory_space<vmem>>, vector<1x1xf32>
      %76 = vector.broadcast %75 : vector<1x1xf32> to vector<8x1xf32>
      %77 = arith.addf %74, %76 : vector<8x1xf32>
      %c0_40 = arith.constant 0 : index
      %c0_41 = arith.constant 0 : index
      %78 = vector.load %arg13[%c0_40, %c0_41] : memref<8x1xf32, #tpu.memory_space<vmem>>, vector<8x1xf32>
      tpu.vector_store %arg13[%c0_40, %c0_41], %77 {strides = array<i32>} : memref<8x1xf32, #tpu.memory_space<vmem>>, vector<8x1xf32>,
    } else {
    }
    return
  }
  func.func @transform_0(%arg0: i32) -> (i32, i32) {
    %c0_i32 = arith.constant 0 : i32
    %c0_i32_0 = arith.constant 0 : i32
    return %arg0, %c0_i32 : i32, i32
  }
  func.func @transform_1(%arg0: i32) -> (i32, i32) {
    %c0_i32 = arith.constant 0 : i32
    %c0_i32_0 = arith.constant 0 : i32
    return %arg0, %c0_i32 : i32, i32
  }
  func.func @transform_2(%arg0: i32) -> (i32, i32) {
    %c0_i32 = arith.constant 0 : i32
    %c0_i32_0 = arith.constant 0 : i32
    return %c0_i32, %arg0 : i32, i32
  }
  func.func @transform_3(%arg0: i32) -> (i32, i32) {
    %c0_i32 = arith.constant 0 : i32
    %c0_i32_0 = arith.constant 0 : i32
    %c0_i32_1 = arith.constant 0 : i32
    return %c0_i32, %c0_i32_0 : i32, i32
  }
  func.func @transform_4(%arg0: i32) -> (i32, i32) {
    %c0_i32 = arith.constant 0 : i32
    %c0_i32_0 = arith.constant 0 : i32
    %c0_i32_1 = arith.constant 0 : i32
    return %c0_i32, %c0_i32_0 : i32, i32
  }
  func.func @transform_5(%arg0: i32) -> (i32, i32) {
    %c0_i32 = arith.constant 0 : i32
    %c0_i32_0 = arith.constant 0 : i32
    %c0_i32_1 = arith.constant 0 : i32
    return %c0_i32, %c0_i32_0 : i32, i32
  }
  func.func @transform_6(%arg0: i32) -> (i32, i32) {
    %c0_i32 = arith.constant 0 : i32
    %c0_i32_0 = arith.constant 0 : i32
    %c0_i32_1 = arith.constant 0 : i32
    return %c0_i32, %c0_i32_0 : i32, i32
  }
  func.func @transform_7(%arg0: i32) -> (i32, i32) {
    %c0_i32 = arith.constant 0 : i32
    %c0_i32_0 = arith.constant 0 : i32
    %c0_i32_1 = arith.constant 0 : i32
    return %c0_i32, %c0_i32_0 : i32, i32
  }
  func.func @transform_8(%arg0: i32) -> (i32, i32) {
    %c0_i32 = arith.constant 0 : i32
    %c0_i32_0 = arith.constant 0 : i32
    %c0_i32_1 = arith.constant 0 : i32
    return %c0_i32, %c0_i32_0 : i32, i32
  }
  func.func @transform_9(%arg0: i32) -> (i32, i32) {
    %c0_i32 = arith.constant 0 : i32
    %c0_i32_0 = arith.constant 0 : i32
    %c0_i32_1 = arith.constant 0 : i32
    return %c0_i32, %c0_i32_0 : i32, i32
  }
  func.func @transform_10(%arg0: i32) -> (i32, i32) {
    %c0_i32 = arith.constant 0 : i32
    %c0_i32_0 = arith.constant 0 : i32
    %c0_i32_1 = arith.constant 0 : i32
    return %c0_i32, %c0_i32_0 : i32, i32
  }
  func.func @transform_11(%arg0: i32) -> (i32, i32) {
    %c0_i32 = arith.constant 0 : i32
    %c0_i32_0 = arith.constant 0 : i32
    %c0_i32_1 = arith.constant 0 : i32
    return %c0_i32, %c0_i32_0 : i32, i32
  }
  func.func @transform_12(%arg0: i32) -> (i32, i32) {
    %c0_i32 = arith.constant 0 : i32
    %c0_i32_0 = arith.constant 0 : i32
    %c0_i32_1 = arith.constant 0 : i32
    return %c0_i32, %c0_i32_0 : i32, i32
  }
}

</mosaic_0001>

<bundles_post_ra>
// kernel: tpu_custom_call.1
= control target key start
LH: loop header
LB: loop body
LE: loop exit
PB: predicated region body
PF: predicated region fallthrough
CT: control target
= control target key end

     0   :  { %s2353_s0 = inlined_call_operand.vmem [shape: bf16[768,6], index: 0, kind: input, shape index: {}]   ;;  %s2354_s1 = inlined_call_operand.vmem [shape: bf16[768,128], index: 1, kind: input, shape index: {}]   ;;  %s2355_s2 = inlined_call_operand.vmem [shape: s32[1,768], index: 2, kind: input, shape index: {}]   ;;  %s2356_s3 = inlined_call_operand.vmem [shape: s32[1,40], index: 3, kind: input, shape index: {}]   ;;  %s2357_s4 = inlined_call_operand.vmem [shape: bf16[6,128], index: 4, kind: input, shape index: {}]   ;;  %s2358_s5 = inlined_call_operand.vmem [shape: f32[1,128], index: 5, kind: input, shape index: {}]   ;;  %s2359_s6 = inlined_call_operand.hbm [shape: bf16[128,128], index: 6, kind: input, shape index: {}]   ;;  %s2360_s7 = inlined_call_operand.vmem [shape: f32[1,128], index: 7, kind: input, shape index: {}]   ;;  %s2361_s8 = inlined_call_operand.hbm [shape: bf16[128,128], index: 8, kind: input, shape index: {}]   ;;  %s2362_s9 = inlined_call_operand.vmem [shape: f32[1,128], index: 9, kind: input, shape index: {}]   ;;  %s2363_s10 = inlined_call_operand.vmem [shape: f32[1,128], index: 10, kind: input, shape index: {}]   ;;  %s2364_s11 = inlined_call_operand.<no memory space> [shape: f32[1,1], index: 11, kind: input, shape index: {}]   ;;  %s2365_s12 = inlined_call_operand.vmem [shape: f32[8,1], index: 12, kind: output, shape index: {}]  }
   0x1   :  { %v17_v0 = vstv %s2364_s11 }
   0x2   :  { %18 = vst [vmem:[#allocation3] sm:$0x1] %v17_v0 }
   0x3   :  { %19 = vsyncpa [#allocation5], 0 }
   0x4   :  { %20 = vsyncpa [#allocation7], 0  ;;  %s2011_s23 = smov 0  }
   0x5 LB: > { %s2017_s24 = sadd.s32 4294967295, %s1933_s23   ;;  %p1457_p0 = scmp.ge.s32.totalorder %s1933_s23, 1  ;;  %s1933_s23 = sphi %s2011_s23, %s26_s23  }
   0x6   : > { %p319_p1 = scmp.lt.s32.totalorder %s1933_s23, 4  ;;  %s1935_s11 = smov [#allocation4]  }
   0x7   : > { %s340_s25 = sshll.u32 %s1935_s11, 4  ;;  %p1805_p4 = scmp.eq.s32.totalorder %s2017_s24, 0  ;;  %s341_s25 = int_to_ptr.vmem [resolvable:$true] %s340_s25 }
   0x8   : > { %p2022_p3 = pnand %p1457_p0, %p319_p1  ;;  %s1936_s27 = smov [#allocation6]  }
   0x9   : > { %s356_s28 = sshll.u32 %s1936_s27, 4  ;;  %s1878_s30 = scalar_lea.vmem %s341_s25, 1024  ;;  %s357_s28 = int_to_ptr.vmem [resolvable:$true] %s356_s28 }
   0xa   : > { %p1798_p5 = pneg %p2022_p3  ;;  %p1879_p8 = scmp.ne.s32.totalorder %s341_s25, %s1878_s30 }
   0xb   : > { %p1886_p11 = scmp.lt.s32.totalorder %s341_s25, %s341_s25  ;;  %p1887_p12 = scmp.lt.s32.totalorder %s1878_s30, %s1878_s30 }
   0xc   : > { %p2031_p6 = pnand %p1805_p4, %p1798_p5 }
   0xd   : > { %p1888_p13 = por %p1887_p12, %p1886_p11 }
   0xe   : > { %p1869_p7 = pneg %p2031_p6 }
  0x10   : > { %p1881_p9 = pnand %p1879_p8, %p1869_p7 }
  0x12   : > { %p1882_p10 = pneg %p1881_p9 }
  0x14   : > { %p1889_p0 = pnand %p1888_p13, %p1882_p10 }
  0x16   : > { %1892 = shalt.err (!%p1889_p0)
}
  0x17   : > { %s1937_s13 = smov 64   ;;  %s1938_s14 = smov 4  }
  0x18   : > { %1801 = dma.hbm_to_vmem [thread:$0]  (!%p2031_p6), %s2359_s6, 1024, %s341_s25, [#allocation5], %s1937_s13, %s1937_s13, %s1938_s14  }
  0x19   : > { %s1904_s17 = scalar_lea.vmem %s357_s28, 1024  ;;  %p1912_p9 = scmp.lt.s32.totalorder %s357_s28, %s357_s28 }
  0x1a   : > { %p1905_p1 = scmp.ne.s32.totalorder %s357_s28, %s1904_s17  ;;  %p1913_p2 = scmp.lt.s32.totalorder %s1904_s17, %s1904_s17 }
  0x1c   : > { %p1907_p5 = pnand %p1905_p1, %p1869_p7  ;;  %p1914_p11 = por %p1913_p2, %p1912_p9 }
  0x1e   : > { %p1908_p8 = pneg %p1907_p5 }
  0x20   : > { %p1915_p10 = pnand %p1914_p11, %p1908_p8 }
  0x22   : > { %1918 = shalt.err (!%p1915_p10)
}
  0x23   : > { %1804 = dma.hbm_to_vmem [thread:$0]  (!%p2031_p6), %s2361_s8, 1024, %s357_s28, [#allocation7], %s1937_s13, %s1937_s13, %s1938_s14  }
  0x24   : > { %407 = sbr.rel (%p2022_p3) target bundleno = 1392 (0x570), region = 68 }
  0x29   : > { %1924 = dma.done.wait (%p1805_p4), [#allocation5], 1024  }
  0x2a   : > { %1926 = vsyncadd (%p1805_p4), [#allocation5], 4294966272 }
  0x2b   : > { %1928 = dma.done.wait (%p1805_p4), [#allocation7], 1024  }
  0x2c   : > { %1930 = vsyncadd (%p1805_p4), [#allocation7], 4294966272  ;;  %s1464_s20 = sshll.u32 %s2017_s24, 5  ;;  %s1468_s21 = sshll.u32 %s2017_s24, 1 }
  0x2d   : > { %p458_p2 = scmp.lt.s32.totalorder %s1464_s20, 95  ;;  %p470_p6 = scmp.lt.s32.totalorder %s1468_s21, 5 }
  0x2e   : > { %p2371_p3 = scmp.ne.s32.totalorder %s2017_s24, 0 }
  0x2f   : > { %s2386_s20 = smov (!%p458_p2, %s1464_s20), 95  ;;  %s2388_s21 = smov (!%p470_p6, %s1468_s21), 5 }
  0x30   : > { %s1465_s22 = sshll.u32 %s2386_s20, 2  ;;  %s472_s14 = scalar_lea.vmem %s2355_s2, %s2388_s21 }
  0x31   : > { %s2070_s26 = scalar_lea.vmem %s2353_s0, %s1465_s22  ;;  %s2075_s29 = scalar_lea.vmem %s2354_s1, %s1465_s22 }
  0x32   : > { %478 = sbr.rel (%p2371_p3) target bundleno = 59 (0x3b), region = 80 }
  0x37   : > { %v1939_v1 = vmov 0.0  }
  0x38   : > { %479 = vst [vmem:[#allocation2 + $0x8] sm:$0xff] %v1939_v1  ;;  %480 = vst [vmem:[#allocation2] sm:$0xff] %v1939_v1 }
  0x39   : > { %481 = vst [vmem:[#allocation2 + $0x20] sm:$0xff] %v1939_v1  ;;  %482 = vst [vmem:[#allocation2 + $0x10] sm:$0xff] %v1939_v1 }
  0x3a   : > { %483 = vst [vmem:[#allocation2 + $0x18] sm:$0xff] %v1939_v1 }
  0x3b PF: > { %v516_v2 = vld [vmem:[%s2357_s4] sm:$0x7]  ;;  %vm653_vm0 = vcmask 1042432   ;;  %vm604_vm1 = vcmask 48128   ;;  %v1826_v5 = vld [vmem:[%s2070_s26 + $0x8] sm:$0xff]   ;;  %v1827_v6 = vld [vmem:[%s2070_s26 + $0x10] sm:$0xff]   ;;  %v915_v20 = vlaneseq }
  0x3c   : > { %v1825_v3 = vld [vmem:[%s2070_s26] sm:$0xff]   ;;  %1789 = vmatprep.subr.msk.bf16.mxu0 %vm653_vm0, %v516_v2  ;;  %v655_v4 = vsel %vm653_vm0, %v516_v2, 0  ;;  %v1828_v7 = vld [vmem:[%s2070_s26 + $0x18] sm:$0xff]   ;;  %v1830_v9 = vld [vmem:[%s2070_s26 + $0x28] sm:$0xff]   ;;  %v2366_v28 = vmov 1.0|1.0  }
  0x3d   : > { %1706 = vmatpush3.bf16.msra.mxu0 %v655_v4  ;;  %1707 = vmatprep.mubr.msk.bf16.mxu0 %vm604_vm1, %v1825_v3  ;;  %v1829_v8 = vld [vmem:[%s2070_s26 + $0x20] sm:$0xff]   ;;  %v1831_v10 = vld [vmem:[%s2070_s26 + $0x30] sm:$0xff]   ;;  %v1832_v11 = vld [vmem:[%s2070_s26 + $0x38] sm:$0xff]   ;;  %v2118_v21 = vshrl.u32 %v915_v20, 7  ;;  %p1525_p4 = scmp.ne.s32.totalorder %s2017_s24, 2 }
  0x3e   : > { %v1833_v12 = vld [vmem:[%s2070_s26 + $0x40] sm:$0xff]   ;;  %v1834_v13 = vld [vmem:[%s2070_s26 + $0x48] sm:$0xff]   ;;  %v1835_v14 = vld [vmem:[%s2070_s26 + $0x50] sm:$0xff]  }
  0x3f   : > { %v1836_v15 = vld [vmem:[%s2070_s26 + $0x58] sm:$0xff]   ;;  %v1837_v16 = vld [vmem:[%s2070_s26 + $0x60] sm:$0xff]   ;;  %v1838_v17 = vld [vmem:[%s2070_s26 + $0x68] sm:$0xff]   ;;  %2372 = vst [vmem:[#allocation10_spill] sm:$0xff] %v2118_v21  ;;  %v927_v22 = vsub.s32 1, %v2118_v21  ;;  %v923_v24 = vsub.s32 0, %v2118_v21 }
  0x40   : > { %1708 = vmatmul.mubr.msk.bf16.vlgmr.msra.gmra.mxu0 %vm604_vm1, %v1826_v5  ;;  %v1839_v18 = vld [vmem:[%s2070_s26 + $0x70] sm:$0xff]   ;;  %v1840_v19 = vld [vmem:[%s2070_s26 + $0x78] sm:$0xff]   ;;  %v914_v23 = vld [vmem:[%s472_s14] sm:$0x3]  ;;  %v917_v25 = vadd.s32 8, %v2118_v21  ;;  %v918_v30 = vadd.s32 16, %v2118_v21 }
  0x41   : > { %1711 = vmatprep.mubr.msk.bf16.mxu0 %vm604_vm1, %v1827_v6  ;;  %v2128_v26 = vrot.slane %v914_v23, %v927_v22  ;;  %v2130_v27 = vrot.slane %v914_v23, %v923_v24  ;;  %v919_v31 = vadd.s32 24, %v2118_v21  ;;  %v2158_v34 = vadd.s32 32, %v2118_v21  ;;  %v2167_v36 = vld [vmem:[%s2358_s5] ss:$0 sm:$0xff]  ;;  %v1617_v37 = vld [vmem:[%s2075_s29 + $0x8] sm:$0xff]   ;;  %v1619_v53 = vld [vmem:[%s2075_s29 + $0x18] sm:$0xff]  }
  0x42   : > { %v1554_v39 = vld [vmem:[%s2075_s29] sm:$0xff]   ;;  %v1559_v41 = vunpack.c.l.bf16 %v1617_v37  ;;  %v1560_v42 = vunpack.c.h.bf16 %v1617_v37  ;;  %v1618_v58 = vld [vmem:[%s2075_s29 + $0x10] sm:$0xff]   ;;  %v1567_v60 = vunpack.c.l.bf16 %v1619_v53  ;;  %v1568_v61 = vunpack.c.h.bf16 %v1619_v53  ;;  %v965_v32 = vld [vmem:[#allocation2 + $0x8] sm:$0xff] }
  0x43   : > { %vm930_vm2 = vcmp.eq.s32.totalorder %v2128_v26, %v2118_v21  ;;  %vm932_vm3 = vcmp.eq.s32.totalorder %v2128_v26, %v917_v25  ;;  %vm929_vm5 = vcmp.eq.s32.totalorder %v2130_v27, %v2118_v21  ;;  %vm931_vm6 = vcmp.eq.s32.totalorder %v2130_v27, %v917_v25  ;;  %v1628_v21 = vld [vmem:[%s2075_s29 + $0x60] sm:$0xff]  }
  0x44   : > { %vm1513_vm4 = vmpackc.low %vm932_vm3, %vm930_vm2  ;;  %vm934_vm8 = vcmp.eq.s32.totalorder %v2128_v26, %v918_v30  ;;  %vm936_vm9 = vcmp.eq.s32.totalorder %v2128_v26, %v919_v31  ;;  %vm933_vm10 = vcmp.eq.s32.totalorder %v2130_v27, %v918_v30  ;;  %vm935_vm11 = vcmp.eq.s32.totalorder %v2130_v27, %v919_v31 }
  0x45   : > { %1514 = vmatprep.mubr.msk.bf16.mxu1 %vm1513_vm4, %v2366_v28  ;;  %vm2139_vm7 = vmpackc.low %vm931_vm6, %vm929_vm5  ;;  %vm938_vm14 = vcmp.eq.s32.totalorder %v2128_v26, %v2158_v34  ;;  %vm937_vm15 = vcmp.eq.s32.totalorder %v2130_v27, %v2158_v34  ;;  %v1555_v45 = vunpack.c.l.bf16 %v1554_v39  ;;  %v1556_v47 = vunpack.c.h.bf16 %v1554_v39 }
  0x46   : > { %vm2149_vm12 = vmpackc.low %vm936_vm9, %vm934_vm8  ;;  %v1563_v1 = vunpack.c.l.bf16 %v1618_v58  ;;  %v1564_v3 = vunpack.c.h.bf16 %v1618_v58 }
  0x47   : > { %vm2153_vm13 = vmpackc.low %vm935_vm11, %vm933_vm10 }
  0x48   : > { %1712 = vmatmul.mubr.msk.bf16.gmra.mxu0 %vm604_vm1, %v1828_v7  ;;  %vm1521_vm0 = vmpackc.low %vm938_vm14, %vm938_vm14 }
  0x49   : > { %1715 = vmatprep.mubr.msk.bf16.mxu0 %vm604_vm1, %v1829_v8 }
  0x50   : > { %1716 = vmatmul.mubr.msk.bf16.gmra.mxu0 %vm604_vm1, %v1830_v9 }
  0x51   : > { %1719 = vmatprep.mubr.msk.bf16.mxu0 %vm604_vm1, %v1831_v10 }
  0x58   : > { %1720 = vmatmul.mubr.msk.bf16.gmra.mxu0 %vm604_vm1, %v1832_v11 }
  0x59   : > { %1723 = vmatprep.mubr.msk.bf16.mxu0 %vm604_vm1, %v1833_v12 }
  0x60   : > { %1724 = vmatmul.mubr.msk.bf16.gmra.mxu0 %vm604_vm1, %v1834_v13 }
  0x61   : > { %1727 = vmatprep.mubr.msk.bf16.mxu0 %vm604_vm1, %v1835_v14 }
  0x68   : > { %1728 = vmatmul.mubr.msk.bf16.gmra.mxu0 %vm604_vm1, %v1836_v15 }
  0x69   : > { %1731 = vmatprep.mubr.msk.bf16.mxu0 %vm604_vm1, %v1837_v16 }
  0x70   : > { %1732 = vmatmul.mubr.msk.bf16.gmra.mxu0 %vm604_vm1, %v1838_v17 }
  0x71   : > { %1735 = vmatprep.mubr.msk.bf16.mxu0 %vm604_vm1, %v1839_v18 }
  0x78   : > { %1736 = vmatmul.mubr.msk.bf16.gmra.mxu0 %vm604_vm1, %v1840_v19  ;;  %vm1523_vm1 = vmpackc.low %vm937_vm15, %vm937_vm15 }
 0x100   : > { %v1709_v35 = vpop.f32.mrf.mxu0 }
 0x101   : > { %v700_v40 = vadd.f32 %v1709_v35, %v2167_v36 }
 0x102   : > { %v691_v38 = vpop.f32.mrf.mxu0 }
 0x103   : > { %v692_v44 = vadd.f32 %v2167_v36, %v691_v38  ;;  %v2174_v49 = vmul.f32 %v1559_v41, %v700_v40 }
 0x104   : > { %v1710_v43 = vpop.f32.mrf.mxu0 }
 0x105   : > { %v703_v46 = vadd.f32 %v1710_v43, %v2167_v36  ;;  %v2180_v54 = vmul.f32 %v1555_v45, %v692_v44  ;;  %v1623_v43 = vld [vmem:[%s2075_s29 + $0x38] sm:$0xff]  }
 0x106   : > { %v694_v48 = vpop.f32.mrf.mxu0  ;;  %v1584_v45 = vunpack.c.h.bf16 %v1623_v43 }
 0x107   : > { %v2176_v50 = vmul.f32 %v1560_v42, %v703_v46  ;;  %v695_v51 = vadd.f32 %v2167_v36, %v694_v48  ;;  %v1631_v42 = vld [vmem:[%s2075_s29 + $0x78] sm:$0xff]  }
 0x108   : > { %v1713_v52 = vpop.f32.mrf.mxu0 }
 0x109   : > { %v2182_v55 = vmul.f32 %v1556_v47, %v695_v51  ;;  %v716_v59 = vadd.f32 %v1713_v52, %v2167_v36  ;;  %v1630_v47 = vld [vmem:[%s2075_s29 + $0x70] sm:$0xff]   ;;  %v1615_v51 = vunpack.c.l.bf16 %v1631_v42  ;;  %v1616_v52 = vunpack.c.h.bf16 %v1631_v42 }
 0x10a   : > { %v707_v57 = vpop.f32.mrf.mxu0 }
 0x10b   : > { %v708_v0 = vadd.f32 %v2167_v36, %v707_v57  ;;  %v2192_v5 = vmul.f32 %v1567_v60, %v716_v59  ;;  %v1583_v57 = vunpack.c.l.bf16 %v1623_v43  ;;  %v1622_v59 = vld [vmem:[%s2075_s29 + $0x30] sm:$0xff]   ;;  %v1629_v60 = vld [vmem:[%s2075_s29 + $0x68] sm:$0xff]  }
 0x10c   : > { %v1714_v63 = vpop.f32.mrf.mxu0  ;;  %v1579_v62 = vunpack.c.l.bf16 %v1622_v59  ;;  %v1607_v56 = vunpack.c.l.bf16 %v1629_v60 }
 0x10d   : > { %v719_v2 = vadd.f32 %v1714_v63, %v2167_v36  ;;  %v2199_v9 = vmul.f32 %v1563_v1, %v708_v0  ;;  %v1611_v63 = vunpack.c.l.bf16 %v1630_v47  ;;  %v1612_v1 = vunpack.c.h.bf16 %v1630_v47 }
 0x10e   : > { %v710_v4 = vpop.f32.mrf.mxu0 }
 0x10f   : > { %v2194_v6 = vmul.f32 %v1568_v61, %v719_v2  ;;  %v711_v7 = vadd.f32 %v2167_v36, %v710_v4  ;;  %v1580_v4 = vunpack.c.h.bf16 %v1622_v59  ;;  %v1620_v59 = vld [vmem:[%s2075_s29 + $0x20] sm:$0xff]  }
 0x110   : > { %v2197_v8 = vpop.f32.mrf.mxu0 }
 0x111   : > { %v2201_v10 = vmul.f32 %v1564_v3, %v711_v7  ;;  %v1608_v7 = vunpack.c.h.bf16 %v1629_v60 }
 0x112   : > { %v2205_v12 = vpop.f32.mrf.mxu0 }
 0x114   : > { %v1718_v14 = vpop.f32.mrf.mxu0 }
 0x115   : > { %v735_v13 = vadd.f32 %v1718_v14, %v2167_v36 }
 0x116   : > { %v2209_v15 = vpop.f32.mrf.mxu0 }
 0x118   : > { %v1721_v16 = vpop.f32.mrf.mxu0 }
 0x119   : > { %v748_v53 = vadd.f32 %v1721_v16, %v2167_v36 }
 0x11a   : > { %v739_v17 = vpop.f32.mrf.mxu0 }
 0x11b   : > { %v896_v28 = vmul.f32 %v1583_v57, %v748_v53 }
 0x11c   : > { %v1722_v18 = vpop.f32.mrf.mxu0 }
 0x11d   : > { %v751_v44 = vadd.f32 %v1722_v18, %v2167_v36 }
 0x11e   : > { %v742_v19 = vpop.f32.mrf.mxu0 }
 0x11f   : > { %v897_v2 = vmul.f32 %v1584_v45, %v751_v44  ;;  %v743_v3 = vadd.f32 %v2167_v36, %v742_v19 }
 0x120   : > { %v2211_v20 = vpop.f32.mrf.mxu0 }
 0x121   : > { %v895_v11 = vmul.f32 %v1580_v4, %v743_v3 }
 0x122   : > { %v2213_v22 = vpop.f32.mrf.mxu0 }
 0x124   : > { %v2215_v23 = vpop.f32.mrf.mxu0 }
 0x126   : > { %v2217_v24 = vpop.f32.mrf.mxu0 }
 0x128   : > { %v2219_v25 = vpop.f32.mrf.mxu0 }
 0x12a   : > { %v2221_v30 = vpop.f32.mrf.mxu0 }
 0x12c   : > { %v2223_v31 = vpop.f32.mrf.mxu0 }
 0x12e   : > { %v2225_v35 = vpop.f32.mrf.mxu0 }
 0x130   : > { %v1733_v37 = vpop.f32.mrf.mxu0 }
 0x131   : > { %v796_v44 = vadd.f32 %v1733_v37, %v2167_v36  ;;  %v732_v37 = vadd.f32 %v2197_v8, %v2167_v36  ;;  %v783_v8 = vadd.f32 %v2223_v31, %v2167_v36 }
 0x132   : > { %v787_v38 = vpop.f32.mrf.mxu0 }
 0x133   : > { %v908_v60 = vmul.f32 %v1607_v56, %v796_v44  ;;  %v788_v14 = vadd.f32 %v2167_v36, %v787_v38  ;;  %v724_v56 = vadd.f32 %v2167_v36, %v2205_v12  ;;  %v1625_v44 = vld [vmem:[%s2075_s29 + $0x48] sm:$0xff]  }
 0x134   : > { %v1734_v39 = vpop.f32.mrf.mxu0 }
 0x136   : > { %v790_v40 = vpop.f32.mrf.mxu0 }
 0x138   : > { %v1737_v41 = vpop.f32.mrf.mxu0 }
 0x139   : > { %v812_v48 = vadd.f32 %v1737_v41, %v2167_v36  ;;  %v799_v41 = vadd.f32 %v1734_v39, %v2167_v36 }
 0x13a   : > { %v803_v46 = vpop.f32.mrf.mxu0 }
 0x13b   : > { %v804_v61 = vadd.f32 %v2167_v36, %v803_v46  ;;  %v912_v42 = vmul.f32 %v1615_v51, %v812_v48  ;;  %v740_v46 = vadd.f32 %v2167_v36, %v739_v17  ;;  %v909_v48 = vmul.f32 %v1608_v7, %v799_v41  ;;  %v1626_v7 = vld [vmem:[%s2075_s29 + $0x50] sm:$0xff]  }
 0x13c   : > { %v1738_v58 = vpop.f32.mrf.mxu0  ;;  %v791_v51 = vadd.f32 %v2167_v36, %v790_v40  ;;  %v1604_v17 = vunpack.c.h.bf16 %v1628_v21  ;;  %v727_v40 = vadd.f32 %v2167_v36, %v2209_v15 }
 0x13d   : > { %v815_v0 = vadd.f32 %v1738_v58, %v2167_v36  ;;  %v1621_v58 = vld [vmem:[%s2075_s29 + $0x28] sm:$0xff]   ;;  %v910_v45 = vmul.f32 %v1611_v63, %v804_v61  ;;  %v894_v57 = vmul.f32 %v1579_v62, %v740_v46  ;;  %v1603_v61 = vunpack.c.l.bf16 %v1628_v21 }
 0x13e   : > { %v806_v18 = vpop.f32.mrf.mxu0  ;;  %v1576_v39 = vunpack.c.h.bf16 %v1621_v58  ;;  %v1575_v53 = vunpack.c.l.bf16 %v1621_v58  ;;  %v1572_v63 = vunpack.c.h.bf16 %v1620_v59  ;;  %v907_v62 = vmul.f32 %v1604_v17, %v791_v51  ;;  %v1624_v17 = vld [vmem:[%s2075_s29 + $0x40] sm:$0xff]  }
 0x13f   : > { %v807_v16 = vadd.f32 %v2167_v36, %v806_v18  ;;  %v913_v43 = vmul.f32 %v1616_v52, %v815_v0  ;;  %v977_v18 = vpack.c.bf16 %v897_v2, %v896_v28  ;;  %v1627_v0 = vld [vmem:[%s2075_s29 + $0x58] sm:$0xff]   ;;  %v983_v3 = vpack.c.bf16 %v909_v48, %v908_v60 }
 0x140   : > { %v893_v28 = vmul.f32 %v1576_v39, %v735_v13  ;;  %v1600_v2 = vunpack.c.h.bf16 %v1627_v0  ;;  %v892_v4 = vmul.f32 %v1575_v53, %v732_v37  ;;  %v1571_v21 = vunpack.c.l.bf16 %v1620_v59 }
 0x141   : > { %v911_v19 = vmul.f32 %v1612_v1, %v807_v16  ;;  %v985_v47 = vpack.c.bf16 %v913_v43, %v912_v42  ;;  %v976_v1 = vpack.c.bf16 %v895_v11, %v894_v57  ;;  %v780_v13 = vadd.f32 %v2219_v25, %v2167_v36 }
 0x142   : > { %v1599_v15 = vunpack.c.l.bf16 %v1627_v0  ;;  %v906_v38 = vmul.f32 %v1603_v61, %v788_v14  ;;  %v891_v11 = vmul.f32 %v1572_v63, %v727_v40  ;;  %v975_v41 = vpack.c.bf16 %v893_v28, %v892_v4  ;;  %v969_v4 = vld [vmem:[#allocation2 + $0x18] sm:$0xff] }
 0x143   : > { %1649 = vmatprep.subr.bf16.mxu1 %v985_v47  ;;  %v984_v52 = vpack.c.bf16 %v911_v19, %v910_v45  ;;  %v905_v31 = vmul.f32 %v1600_v2, %v783_v8  ;;  %v775_v16 = vadd.f32 %v2167_v36, %v2225_v35  ;;  %v1596_v42 = vunpack.c.h.bf16 %v1626_v7 }
 0x144   : > { %1650 = vmatpush3.bf16.msra.mxu1 %v977_v18  ;;  %v982_v43 = vpack.c.bf16 %v907_v62, %v906_v38  ;;  %v890_v46 = vmul.f32 %v1571_v21, %v724_v56  ;;  %v904_v12 = vmul.f32 %v1599_v15, %v780_v13  ;;  %v772_v25 = vadd.f32 %v2167_v36, %v2221_v30 }
 0x145   : > { %1651 = vmatprep.subr.bf16.mxu1 %v984_v52  ;;  %v1595_v58 = vunpack.c.l.bf16 %v1626_v7  ;;  %v767_v19 = vadd.f32 %v2215_v23, %v2167_v36  ;;  %v1592_v47 = vunpack.c.h.bf16 %v1625_v44  ;;  %v903_v39 = vmul.f32 %v1596_v42, %v775_v16 }
 0x146   : > { %v974_v45 = vpack.c.bf16 %v891_v11, %v890_v46  ;;  %v981_v18 = vpack.c.bf16 %v905_v31, %v904_v12  ;;  %v764_v35 = vadd.f32 %v2211_v20, %v2167_v36  ;;  %v1591_v48 = vunpack.c.l.bf16 %v1625_v44 }
 0x147   : > { %v902_v51 = vmul.f32 %v1595_v58, %v772_v25  ;;  %v901_v52 = vmul.f32 %v1592_v47, %v767_v19  ;;  %v759_v30 = vadd.f32 %v2167_v36, %v2217_v24  ;;  %v1588_v37 = vunpack.c.h.bf16 %v1624_v17 }
 0x148   : > { %1652 = vmatpush3.bf16.msra.mxu1 %v976_v1  ;;  %v2379_v23 = vpack.c.bf16 %v2194_v6, %v2192_v5  ;;  %v900_v57 = vmul.f32 %v1591_v48, %v764_v35  ;;  %v756_v59 = vadd.f32 %v2167_v36, %v2213_v22  ;;  %v1587_v60 = vunpack.c.l.bf16 %v1624_v17  ;;  %v967_v22 = vld [vmem:[#allocation2 + $0x20] sm:$0xff]  ;;  %v968_v1 = vld [vmem:[#allocation2 + $0x10] sm:$0xff] }
 0x149   : > { %1653 = vmatprep.subr.bf16.mxu1 %v983_v3  ;;  %v980_v53 = vpack.c.bf16 %v903_v39, %v902_v51  ;;  %v899_v20 = vmul.f32 %v1588_v37, %v759_v30  ;;  %v2380_v61 = vpack.c.bf16 %v2201_v10, %v2199_v9  ;;  %v2381_v40 = vpack.c.bf16 %v2176_v50, %v2174_v49 }
 0x14a   : > { %v979_v14 = vpack.c.bf16 %v901_v52, %v900_v57  ;;  %v898_v28 = vmul.f32 %v1587_v60, %v756_v59  ;;  %v2382_v5 = vpack.c.bf16 %v2182_v55, %v2180_v54  ;;  %v2383_v36 = vmov 1.0|1.0   ;;  %v966_v55 = vld [vmem:[#allocation2] sm:$0xff] }
 0x14c   : > { %1654 = vmatpush3.bf16.msra.mxu1 %v975_v41  ;;  %v978_v24 = vpack.c.bf16 %v899_v20, %v898_v28 }
 0x14d   : > { %1655 = vmatprep.subr.bf16.mxu1 %v982_v43 }
 0x150   : > { %1656 = vmatpush3.bf16.msra.mxu1 %v974_v45 }
 0x151   : > { %1657 = vmatprep.subr.bf16.mxu1 %v981_v18 }
 0x154   : > { %1658 = vmatpush3.bf16.msra.mxu1 %v2379_v23 }
 0x155   : > { %1659 = vmatprep.subr.bf16.mxu1 %v980_v53 }
 0x158   : > { %1660 = vmatpush3.bf16.msra.mxu1 %v2380_v61 }
 0x159   : > { %1661 = vmatprep.subr.bf16.mxu1 %v979_v14 }
 0x15c   : > { %1662 = vmatpush3.bf16.msra.mxu1 %v2381_v40 }
 0x15d   : > { %1663 = vmatprep.subr.bf16.mxu1 %v978_v24 }
 0x160   : > { %1664 = vmatpush3.bf16.msra.mxu1 %v2382_v5 }
 0x163   : > { %1516 = vmatmul.mubr.msk.bf16.vlgmr.msra.gmra.mxu1 %vm2139_vm7, %v2383_v36 }
 0x164   : > { %1518 = vmatprep.mubr.msk.bf16.mxu1 %vm2149_vm12, %v2383_v36 }
 0x16b   : > { %1520 = vmatmul.mubr.msk.bf16.gmra.mxu1 %vm2153_vm13, %v2383_v36 }
 0x16c   : > { %1522 = vmatprep.mubr.msk.bf16.mxu1 %vm1521_vm0, %v2383_v36 }
 0x173   : > { %1524 = vmatmul.mubr.msk.bf16.gmra.mxu1 %vm1523_vm1, %v2383_v36 }
 0x223   : > { %v1665_v29 = vpop.f32.mrf.mxu1 }
 0x225   : > { %v1666_v49 = vpop.f32.mrf.mxu1 }
 0x226   : > { %v1667_v50 = vadd.f32 %v1666_v49, %v1665_v29 }
 0x227   : > { %v1668_v26 = vpop.f32.mrf.mxu1 }
 0x228   : > { %v1042_v54 = vadd.f32 %v1667_v50, %v965_v32 }
 0x229   : > { %v1669_v6 = vpop.f32.mrf.mxu1 }
 0x22a   : > { %1047 = vst [vmem:[#allocation2 + $0x8] sm:$0xff] %v1042_v54  ;;  %v1670_v33 = vadd.f32 %v1669_v6, %v1668_v26 }
 0x22b   : > { %v1671_v9 = vpop.f32.mrf.mxu1 }
 0x22c   : > { %v1043_v10 = vadd.f32 %v1670_v33, %v966_v55 }
 0x22d   : > { %v1672_v63 = vpop.f32.mrf.mxu1 }
 0x22e   : > { %1048 = vst [vmem:[#allocation2] sm:$0xff] %v1043_v10  ;;  %v1673_v27 = vadd.f32 %v1672_v63, %v1671_v9 }
 0x22f   : > { %v1674_v34 = vpop.f32.mrf.mxu1 }
 0x230   : > { %v1044_v0 = vadd.f32 %v1673_v27, %v967_v22 }
 0x231   : > { %v1675_v8 = vpop.f32.mrf.mxu1 }
 0x232   : > { %1049 = vst [vmem:[#allocation2 + $0x20] sm:$0xff] %v1044_v0  ;;  %v1676_v2 = vadd.f32 %v1675_v8, %v1674_v34 }
 0x233   : > { %v1677_v62 = vpop.f32.mrf.mxu1 }
 0x234   : > { %v1045_v3 = vadd.f32 %v1676_v2, %v968_v1 }
 0x235   : > { %v1678_v56 = vpop.f32.mrf.mxu1 }
 0x236   : > { %1050 = vst [vmem:[#allocation2 + $0x10] sm:$0xff] %v1045_v3  ;;  %v1679_v21 = vadd.f32 %v1678_v56, %v1677_v62  ;;  %1055 = sbr.rel (%p1525_p4) target bundleno = 1392 (0x570), region = 84 }
 0x237   : > { %v1680_v13 = vpop.f32.mrf.mxu1 }
 0x238   : > { %v1046_v15 = vadd.f32 %v1679_v21, %v969_v4 }
 0x239   : > { %v1681_v38 = vpop.f32.mrf.mxu1 }
 0x23a   : > { %1051 = vst [vmem:[#allocation2 + $0x18] sm:$0xff] %v1046_v15 }
 0x23b   : > { %vm1077_vm2 = vcmask 1043456   ;;  %v1941_v7 = vmov 0.0   ;;  %v1067_v31 = vld [vmem:[#allocation2 + $0x20] sm:$0xff]  ;;  %vm1942_vm3 = vmmov 0   ;;  %v2384_v43 = vld [vmem:[#allocation10_spill] sm:$0xff]  ;;  %vm1073_vm5 = vcmask 326656  }
 0x23c   : > { %1739 = vmatprep.subr.bf16.mxu0 %v1941_v7  ;;  %1745 = vmatprep.mubr.msk.bf16.mxu0 %vm1942_vm3, %v1941_v7  ;;  %v1526_v42 = vld [vmem:[%s2356_s3] ss:$0 sm:$0xff]  ;;  %v1841_v46 = vld [vmem:[#allocation4 + $0x38] sm:$0xff]   ;;  %v1843_v39 = vld [vmem:[#allocation4 + $0x28] sm:$0xff]   ;;  %vm1383_vm6 = vcmask 7168  }
 0x23d   : > { %v1068_v16 = vld [vmem:[#allocation2 + $0x10] sm:$0xff]  ;;  %vm1061_vm4 = vcmp.eq.s32.totalorder %v1526_v42, %v2384_v43  ;;  %1749 = vmatprep.subr.bf16.mxu1 %v1941_v7  ;;  %1765 = vmatprep.mubr.msk.bf16.mxu1 %vm1942_vm3, %v1941_v7  ;;  %v1065_v25 = vld [vmem:[#allocation2 + $0x8] sm:$0xff]  ;;  %v1842_v19 = vld [vmem:[#allocation4 + $0x30] sm:$0xff]  }
 0x23e   : > { %v1527_v58 = vsel %vm1061_vm4, 1.0, %v1941_v7  ;;  %v1071_v44 = vpack.c.bf16 %v1068_v16, %v1067_v31  ;;  %1750 = vmatpush3.bf16.msra.mxu1 %v1841_v46  ;;  %v1066_v47 = vld [vmem:[#allocation2] sm:$0xff]  ;;  %v1844_v48 = vld [vmem:[#allocation4 + $0x20] sm:$0xff]   ;;  %v1847_v52 = vld [vmem:[#allocation4 + $0x8] sm:$0xff]  }
 0x23f   : > { %v1121_v45 = vsel %vm1073_vm5, %v1527_v58, 0.0  ;;  %1751 = vmatprep.subr.bf16.mxu1 %v1941_v7  ;;  %v1070_v18 = vpack.c.bf16 %v1066_v47, %v1065_v25  ;;  %v1064_v35 = vpack.c.bf16 %v1527_v58, %v1527_v58  ;;  %v1845_v51 = vld [vmem:[#allocation4 + $0x18] sm:$0xff]   ;;  %v1846_v17 = vld [vmem:[#allocation4 + $0x10] sm:$0xff]   ;;  %v1848_v30 = vld [vmem:[#allocation4] sm:$0xff]  }
 0x240   : > { %1122 = vadd.xlane.f32.xlu0 %v1121_v45  ;;  %v1849_v28 = vld [vmem:[#allocation6 + $0x38] sm:$0xff]   ;;  %v1850_v24 = vld [vmem:[#allocation6 + $0x30] sm:$0xff]   ;;  %v1851_v40 = vld [vmem:[#allocation6 + $0x28] sm:$0xff]  }
 0x241   : > { %v1069_v11 = vld [vmem:[#allocation2 + $0x18] sm:$0xff]  ;;  %v1852_v5 = vld [vmem:[#allocation6 + $0x20] sm:$0xff]   ;;  %v1853_v36 = vld [vmem:[#allocation6 + $0x18] sm:$0xff]  }
 0x242   : > { %v1072_v41 = vpack.c.bf16 %v1069_v11, %v1069_v11  ;;  %1752 = vmatpush3.bf16.msra.mxu1 %v1842_v19  ;;  %v1854_v29 = vld [vmem:[#allocation6 + $0x10] sm:$0xff]   ;;  %v1855_v32 = vld [vmem:[#allocation6 + $0x8] sm:$0xff]   ;;  %v1856_v49 = vld [vmem:[#allocation6] sm:$0xff]  }
 0x243   : > { %1753 = vmatprep.subr.bf16.mxu1 %v1941_v7  ;;  %v1529_v50 = vld [vmem:[%s2360_s7] ss:$0 sm:$0xff] }
 0x244   : > { %v1079_v12 = vsel %vm1077_vm2, %v1072_v41, 0  ;;  %v1539_v0 = vld [vmem:[%s2362_s9] ss:$0 sm:$0xff] }
 0x245   : > { %1740 = vmatpush3.bf16.msra.mxu0 %v1079_v12  ;;  %v1549_v15 = vld [vmem:[%s2363_s10] ss:$0 sm:$0xff] }
 0x246   : > { %1741 = vmatprep.subr.bf16.mxu0 %v1941_v7  ;;  %1754 = vmatpush3.bf16.msra.mxu1 %v1843_v39 }
 0x247   : > { %1755 = vmatprep.subr.bf16.mxu1 %v1941_v7 }
 0x249   : > { %1742 = vmatpush3.bf16.msra.mxu0 %v1071_v44 }
 0x24a   : > { %1743 = vmatprep.subr.bf16.mxu0 %v1941_v7  ;;  %1756 = vmatpush3.bf16.msra.mxu1 %v1844_v48 }
 0x24b   : > { %1757 = vmatprep.subr.bf16.mxu1 %v1941_v7 }
 0x24d   : > { %1744 = vmatpush3.bf16.msra.mxu0 %v1070_v18 }
 0x24e   : > { %1769 = vmatprep.subr.bf16.mxu0 %v1941_v7  ;;  %1758 = vmatpush3.bf16.msra.mxu1 %v1845_v51 }
 0x24f   : > { %1759 = vmatprep.subr.bf16.mxu1 %v1941_v7 }
 0x250   : > { %1746 = vmatmul.mubr.msk.bf16.vlgmr.msra.gmra.mxu0 %vm1073_vm5, %v1064_v35 }
 0x251   : > { %1785 = vmatprep.mubr.msk.bf16.mxu0 %vm1942_vm3, %v1941_v7  ;;  %1770 = vmatpush3.bf16.msra.mxu0 %v1849_v28 }
 0x252   : > { %1760 = vmatpush3.bf16.msra.mxu1 %v1846_v17  ;;  %1771 = vmatprep.subr.bf16.mxu0 %v1941_v7 }
 0x253   : > { %1761 = vmatprep.subr.bf16.mxu1 %v1941_v7 }
 0x255   : > { %1772 = vmatpush3.bf16.msra.mxu0 %v1850_v24 }
 0x256   : > { %1762 = vmatpush3.bf16.msra.mxu1 %v1847_v52  ;;  %1773 = vmatprep.subr.bf16.mxu0 %v1941_v7 }
 0x257   : > { %1763 = vmatprep.subr.bf16.mxu1 %v1941_v7 }
 0x259   : > { %1774 = vmatpush3.bf16.msra.mxu0 %v1851_v40 }
 0x25a   : > { %1764 = vmatpush3.bf16.msra.mxu1 %v1848_v30  ;;  %1775 = vmatprep.subr.bf16.mxu0 %v1941_v7 }
 0x25d   : > { %1776 = vmatpush3.bf16.msra.mxu0 %v1852_v5 }
 0x25e   : > { %1777 = vmatprep.subr.bf16.mxu0 %v1941_v7 }
 0x261   : > { %1778 = vmatpush3.bf16.msra.mxu0 %v1853_v36 }
 0x262   : > { %1779 = vmatprep.subr.bf16.mxu0 %v1941_v7 }
 0x265   : > { %1780 = vmatpush3.bf16.msra.mxu0 %v1854_v29 }
 0x266   : > { %1781 = vmatprep.subr.bf16.mxu0 %v1941_v7 }
 0x269   : > { %1782 = vmatpush3.bf16.msra.mxu0 %v1855_v32 }
 0x26a   : > { %1783 = vmatprep.subr.bf16.mxu0 %v1941_v7  ;;  %v1550_v7 = vld [vmem:[#allocation3] ss:$0 sm:$0xff] }
 0x26d   : > { %1784 = vmatpush3.bf16.msra.mxu0 %v1856_v49 }
 0x2c9   : > { %v1123_v37 = vpop.xlane.xlu0 %1122 }
 0x2ca   : > { %v1124_v53 = vmax.f32 %v1123_v37, 1.0 }
 0x2cc   : > { %1857 = vrcp.f32 %v1124_v53 }
 0x2d9   : > { %v1858_v23 = vpop.eup %1857 }
 0x310   : > { %v1115_v57 = vpop.f32.mrf.mxu0 }
 0x311   : > { %v1126_v59 = vmul.f32 %v1858_v23, %v1115_v57 }
 0x312   : > { %v1747_v60 = vpop.f32.mrf.mxu0 }
 0x313   : > { %v1127_v20 = vpack.c.bf16 %v1126_v59, %v1126_v59 }
 0x314   : > { %v1118_v14 = vpop.f32.mrf.mxu0 }
 0x315   : > { %1766 = vmatmul.mubr.bf16.vlgmr.msra.gmra.mxu1 %v1127_v20 }
 0x316   : > { %v1748_v61 = vpop.f32.mrf.mxu0 }
 0x3d5   : > { %v1233_v26 = vpop.f32.mrf.mxu1 }
 0x3d6   : > { %v1234_v54 = vadd.f32 %v1529_v50, %v1233_v26 }
 0x3d7   : > { %v1767_v55 = vpop.f32.mrf.mxu1 }
 0x3d8   : > { %v1538_v6 = vmul.f32 -1.442695, %v1234_v54 }
 0x3d9   : > { %v1236_v33 = vpop.f32.mrf.mxu1 }
 0x3da   : > { %1859 = vpow2.f32 %v1538_v6 }
 0x3db   : > { %v1768_v9 = vpop.f32.mrf.mxu1 }
 0x3e7   : > { %v1860_v10 = vpop.eup %1859 }
 0x3e8   : > { %v1242_v22 = vadd.f32 1.0, %v1860_v10 }
 0x3ea   : > { %1861 = vrcp.f32 %v1242_v22 }
 0x3f7   : > { %v1862_v63 = vpop.eup %1861 }
 0x3f8   : > { %v1245_v27 = vmul.f32 %v1862_v63, %v1234_v54 }
 0x3fa   : > { %v1246_v34 = vpack.c.bf16 %v1245_v27, %v1245_v27 }
 0x3fc   : > { %1786 = vmatmul.mubr.bf16.vlgmr.msra.gmra.mxu0 %v1246_v34 }
 0x4bc   : > { %v1352_v1 = vpop.f32.mrf.mxu0 }
 0x4bd   : > { %v1353_v8 = vadd.f32 %v1539_v0, %v1352_v1 }
 0x4be   : > { %v1787_v2 = vpop.f32.mrf.mxu0 }
 0x4bf   : > { %v1548_v62 = vmul.f32 -1.442695, %v1353_v8 }
 0x4c0   : > { %v1355_v3 = vpop.f32.mrf.mxu0 }
 0x4c1   : > { %1863 = vpow2.f32 %v1548_v62 }
 0x4c2   : > { %v1788_v4 = vpop.f32.mrf.mxu0 }
 0x4ce   : > { %v1864_v56 = vpop.eup %1863 }
 0x4cf   : > { %v1361_v21 = vadd.f32 1.0, %v1864_v56 }
 0x4d1   : > { %1865 = vrcp.f32 %v1361_v21 }
 0x4de   : > { %v1866_v13 = vpop.eup %1865 }
 0x4df   : > { %v1364_v38 = vmul.f32 %v1866_v13, %v1353_v8 }
 0x4e1   : > { %v1372_v11 = vmul.f32 %v1549_v15, %v1364_v38 }
 0x4e3   : > { %1373 = vadd.xlane.f32.xlu0 %v1372_v11 }
 0x56c   : > { %v1374_v41 = vpop.xlane.xlu0 %1373 }
 0x56d   : > { %v1382_v31 = vadd.f32 %v1550_v7, %v1374_v41 }
 0x56f   : > { %1384 = vst.msk [vmem:[%s2365_s12] sm:$0xff] %vm1383_vm6, %v1382_v31 }
 0x570 PF: > { %s26_s23 = sadd.s32 1, %s1933_s23  }
 0x571   : > { %p23_p7 = scmp.ge.s32.totalorder %s26_s23, 5  }
 0x573   :  { %25 = sbr.rel (!%p23_p7) target bundleno = 5 (0x5), region = 117 }
 0x578   :  { %1396 = vsyncpa [#allocation5], 1 }
 0x579   :  { %1398 = vsyncpa [#allocation5 + $0x1], 1 }
 0x57a   :  { %1399 = vsyncpa [#allocation7], 1 }

</bundles_post_ra>
